<compile_context>
chip_gen: v5e
topology: v5e:2x2
jax: 0.10.0
libtpu: 0.0.40
codegen_flags: <defaults>
</compile_context>

<pallas_src>
import functools

import jax
import jax.numpy as jnp
from jax import lax
from jax.experimental import pallas as pl
from jax.experimental.pallas import tpu as pltpu


def rnn_kernel(ids_ref, wte_ref, wx_ref, wh_ref, bc_ref, h0_ref, wlm_ref,
               blm_ref, out_ref, hid_ref, *, seq_len, batch):
    """Whole forward pass in one invocation.

    ids_ref : (T*B, 1) int32  time-major token ids (row = t*B + b)
    wte_ref : (V, E)          embedding table
    wx_ref  : (E, H)          Cw rows acting on the embedding part
    wh_ref  : (H, H)          Cw rows acting on the previous hidden state
    bc_ref  : (T*B, H)        Cw bias, pre-broadcast over (t, b)
    h0_ref  : (B, H)          initial hidden state (start, pre-broadcast)
    wlm_ref : (H, V)          lm_head weight
    blm_ref : (1, V)          lm_head bias
    out_ref : (T*B, V)        logits, time-major (row = t*B + b)
    hid_ref : (T*B, H)        VMEM scratch holding all hidden states, time-major
    """
    T, B = seq_len, batch
    TB = T * B
    V = wte_ref.shape[0]

    # ---------------- prologue: everything off the serial chain -------------
    # In-kernel embedding "gather" as a one-hot matmul on the MXU: exact, since
    # exactly one product per output element is nonzero; no dynamic gathers.
    ids = ids_ref[...]                                            # (TB, 1) i32
    onehot = (ids == lax.broadcasted_iota(jnp.int32, (TB, V), 1)
              ).astype(jnp.float32)                               # (TB, V)
    emb = jnp.dot(onehot, wte_ref[...],
                  preferred_element_type=jnp.float32)             # (TB, E)

    # Hoisted input projection: xt @ Wx + bC for every (t, b) in ONE matmul.
    xw = (jnp.dot(emb, wx_ref[...], preferred_element_type=jnp.float32)
          + bc_ref[...])                                          # (TB, H)

    wh = wh_ref[...]                                              # (H, H)

    # --------- serial recurrence: only Wh-matmul + add + tanh on chain ------
    h = h0_ref[...]                                               # (B, H)
    for t in range(T):   # static unroll (T tiny); scheduler sees across steps
        h = jnp.tanh(xw[t * B:(t + 1) * B, :]
                     + jnp.dot(h, wh, preferred_element_type=jnp.float32))
        # One contiguous (B, H) time-major store per step; off the chain.
        hid_ref[pl.ds(t * B, B), :] = h

    # ------------- epilogue: time-parallel lm_head, one dense matmul --------
    out_ref[...] = (jnp.dot(hid_ref[...], wlm_ref[...],
                            preferred_element_type=jnp.float32)
                    + blm_ref[...])


def rnn_forward(x_ids, params, *, n_embd, n_embd2, vocab_size):
    """x_ids: (B, T) int32 token ids. Returns logits (B, T, vocab_size) f32."""
    wte, start, cw_w, cw_b, lm_w, lm_b = (
        params["wte"], params["start"], params["cw_w"], params["cw_b"],
        params["lm_w"], params["lm_b"])

    B, T = x_ids.shape
    E, H, V = n_embd, n_embd2, vocab_size
    TB = T * B

    # Time-major ids (row = t*B + b); the gather itself happens in-kernel.
    ids_tm = x_ids.T.reshape(TB, 1).astype(jnp.int32)

    # Split Cw weight into the embedding part and the hidden part.
    wx = cw_w[:E, :]                                              # (E, H)
    wh = cw_w[E:, :]                                              # (H, H)
    bc = jnp.broadcast_to(cw_b.reshape(1, H), (TB, H))            # fold broadcast
    h0 = jnp.broadcast_to(start, (B, H))                          # start.expand
    blm = lm_b.reshape(1, V)

    grid_spec = pltpu.PrefetchScalarGridSpec(
        num_scalar_prefetch=0,
        grid=(1,),
        in_specs=[
            pl.BlockSpec((TB, 1), lambda i: (0, 0)),   # token ids (time-major)
            pl.BlockSpec((V, E), lambda i: (0, 0)),    # wte
            pl.BlockSpec((E, H), lambda i: (0, 0)),    # Wx
            pl.BlockSpec((H, H), lambda i: (0, 0)),    # Wh
            pl.BlockSpec((TB, H), lambda i: (0, 0)),   # bC (pre-broadcast)
            pl.BlockSpec((B, H), lambda i: (0, 0)),    # h0
            pl.BlockSpec((H, V), lambda i: (0, 0)),    # W_lm
            pl.BlockSpec((1, V), lambda i: (0, 0)),    # b_lm
        ],
        out_specs=pl.BlockSpec((TB, V), lambda i: (0, 0)),
        scratch_shapes=[pltpu.VMEM((TB, H), jnp.float32)],        # hidden slab
    )

    kernel = functools.partial(rnn_kernel, seq_len=T, batch=B)

    logits_tm = pl.pallas_call(
        kernel,
        out_shape=jax.ShapeDtypeStruct((TB, V), jnp.float32),
        grid_spec=grid_spec,
        compiler_params=pltpu.CompilerParams(
            # Single sequential invocation; the recurrence cannot be split.
            dimension_semantics=("arbitrary",)),
    )(ids_tm, wte, wx, wh, bc, h0, lm_w, blm)

    # Rows are time-major (t*B + b): reshape + tiny 8 KB transpose -> (B, T, V).
    return jnp.transpose(logits_tm.reshape(T, B, V), (1, 0, 2))


def rnn_forward_ref(x_ids, params, *, n_embd, n_embd2, vocab_size):
    """Pure-JAX reference mirroring the PyTorch forward exactly."""
    wte, start, cw_w, cw_b, lm_w, lm_b = (
        params["wte"], params["start"], params["cw_w"], params["cw_b"],
        params["lm_w"], params["lm_b"])
    B, T = x_ids.shape
    emb = jnp.take(wte, x_ids, axis=0)            # (B, T, E)
    hprev = jnp.broadcast_to(start, (B, n_embd2))
    hiddens = []
    for i in range(T):
        xt = emb[:, i, :]
        cat = jnp.concatenate([xt, hprev], axis=1)
        hi = jnp.tanh(cat @ cw_w + cw_b)
        hprev = hi
        hiddens.append(hi)
    hidden = jnp.stack(hiddens, axis=1)           # (B, T, H)
    return hidden @ lm_w + lm_b                   # (B, T, V)


if __name__ == "__main__":
    # Small config consistent with the module's forward.
    B, T = 2, 8            # batch, block_size (sequence length)
    E, H, V = 32, 32, 128  # n_embd, n_embd2, vocab_size
    dtype = jnp.float32

    key = jax.random.PRNGKey(0)
    k_wte, k_cww, k_cwb, k_lmw, k_lmb, k_x = jax.random.split(key, 6)

    params = {
        "start": jnp.zeros((1, H), dtype=dtype),                             # self.start
        "wte": jax.random.normal(k_wte, (V, E), dtype=dtype) * 0.02,         # Embedding
        "cw_w": jax.random.normal(k_cww, (E + H, H), dtype=dtype)
                * (1.0 / jnp.sqrt(E + H)),                                   # Cw.weight (in,out)
        "cw_b": jax.random.normal(k_cwb, (H,), dtype=dtype) * 0.01,          # Cw.bias
        "lm_w": jax.random.normal(k_lmw, (H, V), dtype=dtype)
                * (1.0 / jnp.sqrt(H)) * 0.1,                                 # lm_head.weight *= 0.1
        "lm_b": jax.random.normal(k_lmb, (V,), dtype=dtype) * 0.01,          # lm_head.bias
    }

    x_ids = jax.random.randint(k_x, (B, T), 0, V, dtype=jnp.int32)

    logits = rnn_forward(x_ids, params, n_embd=E, n_embd2=H, vocab_size=V)
    logits = jax.block_until_ready(logits)

    ref = rnn_forward_ref(x_ids, params, n_embd=E, n_embd2=H, vocab_size=V)
    assert logits.shape == (B, T, V), logits.shape
    assert jnp.allclose(logits, ref, atol=1e-5, rtol=1e-5), \
        float(jnp.max(jnp.abs(logits - ref)))

    print("KERNEL_OK")
</pallas_src>

<mosaic_0001>
module attributes {stable_mosaic.version = 11 : i64} {
  func.func @rnn_kernel(%arg0: i32, %arg1: memref<16x1xi32, #tpu.memory_space<vmem>>, %arg2: memref<128x32xf32, #tpu.memory_space<vmem>>, %arg3: memref<32x32xf32, #tpu.memory_space<vmem>>, %arg4: memref<32x32xf32, #tpu.memory_space<vmem>>, %arg5: memref<16x32xf32, #tpu.memory_space<vmem>>, %arg6: memref<2x32xf32, #tpu.memory_space<vmem>>, %arg7: memref<32x128xf32, #tpu.memory_space<vmem>>, %arg8: memref<1x128xf32, #tpu.memory_space<vmem>>, %arg9: memref<16x128xf32, #tpu.memory_space<vmem>>, %arg10: memref<16x32xf32, #tpu.memory_space<vmem>>) attributes {dimension_semantics = [#tpu.dimension_semantics<arbitrary>], iteration_bounds = array<i64: 1>, scalar_prefetch = 0 : i64, scratch_operands = 1 : i64, tpu.core_type = #tpu.core_type<tc>, window_params = [{pipeline_mode = #tpu.pipeline_mode<synchronous>, transform_indices = @transform_0, window_bounds = array<i64: 16, 1>}, {pipeline_mode = #tpu.pipeline_mode<synchronous>, transform_indices = @transform_1, window_bounds = array<i64: 128, 32>}, {pipeline_mode = #tpu.pipeline_mode<synchronous>, transform_indices = @transform_2, window_bounds = array<i64: 32, 32>}, {pipeline_mode = #tpu.pipeline_mode<synchronous>, transform_indices = @transform_3, window_bounds = array<i64: 32, 32>}, {pipeline_mode = #tpu.pipeline_mode<synchronous>, transform_indices = @transform_4, window_bounds = array<i64: 16, 32>}, {pipeline_mode = #tpu.pipeline_mode<synchronous>, transform_indices = @transform_5, window_bounds = array<i64: 2, 32>}, {pipeline_mode = #tpu.pipeline_mode<synchronous>, transform_indices = @transform_6, window_bounds = array<i64: 32, 128>}, {pipeline_mode = #tpu.pipeline_mode<synchronous>, transform_indices = @transform_7, window_bounds = array<i64: 1, 128>}, {pipeline_mode = #tpu.pipeline_mode<synchronous>, transform_indices = @transform_8, window_bounds = array<i64: 16, 128>}]} {
    %c0 = arith.constant 0 : index
    %c0_0 = arith.constant 0 : index
    %0 = vector.load %arg1[%c0, %c0_0] : memref<16x1xi32, #tpu.memory_space<vmem>>, vector<16x1xi32>
    %1 = tpu.iota {dimensions = array<i32: 1>} : vector<16x128xi32>
    %2 = vector.broadcast %0 : vector<16x1xi32> to vector<16x128xi32>
    %3 = arith.cmpi eq, %2, %1 : vector<16x128xi32>
    %4 = arith.extui %3 : vector<16x128xi1> to vector<16x128xi32>
    %5 = arith.sitofp %4 : vector<16x128xi32> to vector<16x128xf32>
    %c0_1 = arith.constant 0 : index
    %c0_2 = arith.constant 0 : index
    %6 = vector.load %arg2[%c0_1, %c0_2] : memref<128x32xf32, #tpu.memory_space<vmem>>, vector<128x32xf32>
    %cst = arith.constant dense<0.000000e+00> : vector<16x32xf32>
    %7 = tpu.matmul %5, %6, %cst {dimension_numbers = #tpu.dot_dimension_numbers<[1], [0], [0], [1], [0, 0, 1, 1], [], []>} : vector<16x128xf32>, vector<128x32xf32>, vector<16x32xf32> -> vector<16x32xf32>
    %c0_3 = arith.constant 0 : index
    %c0_4 = arith.constant 0 : index
    %8 = vector.load %arg3[%c0_3, %c0_4] : memref<32x32xf32, #tpu.memory_space<vmem>>, vector<32x32xf32>
    %cst_5 = arith.constant dense<0.000000e+00> : vector<16x32xf32>
    %9 = tpu.matmul %7, %8, %cst_5 {dimension_numbers = #tpu.dot_dimension_numbers<[1], [0], [0], [1], [0, 0, 1, 1], [], []>} : vector<16x32xf32>, vector<32x32xf32>, vector<16x32xf32> -> vector<16x32xf32>
    %c0_6 = arith.constant 0 : index
    %c0_7 = arith.constant 0 : index
    %10 = vector.load %arg5[%c0_6, %c0_7] : memref<16x32xf32, #tpu.memory_space<vmem>>, vector<16x32xf32>
    %11 = arith.addf %9, %10 : vector<16x32xf32>
    %c0_8 = arith.constant 0 : index
    %c0_9 = arith.constant 0 : index
    %12 = vector.load %arg4[%c0_8, %c0_9] : memref<32x32xf32, #tpu.memory_space<vmem>>, vector<32x32xf32>
    %c0_10 = arith.constant 0 : index
    %c0_11 = arith.constant 0 : index
    %13 = vector.load %arg6[%c0_10, %c0_11] : memref<2x32xf32, #tpu.memory_space<vmem>>, vector<2x32xf32>
    %14 = vector.extract_strided_slice %11 {offsets = [0, 0], sizes = [2, 32], strides = [1, 1]} : vector<16x32xf32> to vector<2x32xf32>
    %cst_12 = arith.constant dense<0.000000e+00> : vector<2x32xf32>
    %15 = tpu.matmul %13, %12, %cst_12 {dimension_numbers = #tpu.dot_dimension_numbers<[1], [0], [0], [1], [0, 0, 1, 1], [], []>} : vector<2x32xf32>, vector<32x32xf32>, vector<2x32xf32> -> vector<2x32xf32>
    %16 = arith.addf %14, %15 : vector<2x32xf32>
    %17 = math.tanh %16 : vector<2x32xf32>
    %c0_13 = arith.constant 0 : index
    %c0_14 = arith.constant 0 : index
    %18 = vector.load %arg10[%c0_13, %c0_14] : memref<16x32xf32, #tpu.memory_space<vmem>>, vector<2x32xf32>
    tpu.vector_store %arg10[%c0_13, %c0_14], %17 {strides = array<i32>} : memref<16x32xf32, #tpu.memory_space<vmem>>, vector<2x32xf32>,
    %19 = vector.extract_strided_slice %11 {offsets = [2, 0], sizes = [2, 32], strides = [1, 1]} : vector<16x32xf32> to vector<2x32xf32>
    %cst_15 = arith.constant dense<0.000000e+00> : vector<2x32xf32>
    %20 = tpu.matmul %17, %12, %cst_15 {dimension_numbers = #tpu.dot_dimension_numbers<[1], [0], [0], [1], [0, 0, 1, 1], [], []>} : vector<2x32xf32>, vector<32x32xf32>, vector<2x32xf32> -> vector<2x32xf32>
    %21 = arith.addf %19, %20 : vector<2x32xf32>
    %22 = math.tanh %21 : vector<2x32xf32>
    %c2 = arith.constant 2 : index
    %c0_16 = arith.constant 0 : index
    %23 = vector.load %arg10[%c2, %c0_16] : memref<16x32xf32, #tpu.memory_space<vmem>>, vector<2x32xf32>
    tpu.vector_store %arg10[%c2, %c0_16], %22 {strides = array<i32>} : memref<16x32xf32, #tpu.memory_space<vmem>>, vector<2x32xf32>,
    %24 = vector.extract_strided_slice %11 {offsets = [4, 0], sizes = [2, 32], strides = [1, 1]} : vector<16x32xf32> to vector<2x32xf32>
    %cst_17 = arith.constant dense<0.000000e+00> : vector<2x32xf32>
    %25 = tpu.matmul %22, %12, %cst_17 {dimension_numbers = #tpu.dot_dimension_numbers<[1], [0], [0], [1], [0, 0, 1, 1], [], []>} : vector<2x32xf32>, vector<32x32xf32>, vector<2x32xf32> -> vector<2x32xf32>
    %26 = arith.addf %24, %25 : vector<2x32xf32>
    %27 = math.tanh %26 : vector<2x32xf32>
    %c4 = arith.constant 4 : index
    %c0_18 = arith.constant 0 : index
    %28 = vector.load %arg10[%c4, %c0_18] : memref<16x32xf32, #tpu.memory_space<vmem>>, vector<2x32xf32>
    tpu.vector_store %arg10[%c4, %c0_18], %27 {strides = array<i32>} : memref<16x32xf32, #tpu.memory_space<vmem>>, vector<2x32xf32>,
    %29 = vector.extract_strided_slice %11 {offsets = [6, 0], sizes = [2, 32], strides = [1, 1]} : vector<16x32xf32> to vector<2x32xf32>
    %cst_19 = arith.constant dense<0.000000e+00> : vector<2x32xf32>
    %30 = tpu.matmul %27, %12, %cst_19 {dimension_numbers = #tpu.dot_dimension_numbers<[1], [0], [0], [1], [0, 0, 1, 1], [], []>} : vector<2x32xf32>, vector<32x32xf32>, vector<2x32xf32> -> vector<2x32xf32>
    %31 = arith.addf %29, %30 : vector<2x32xf32>
    %32 = math.tanh %31 : vector<2x32xf32>
    %c6 = arith.constant 6 : index
    %c0_20 = arith.constant 0 : index
    %33 = vector.load %arg10[%c6, %c0_20] : memref<16x32xf32, #tpu.memory_space<vmem>>, vector<2x32xf32>
    tpu.vector_store %arg10[%c6, %c0_20], %32 {strides = array<i32>} : memref<16x32xf32, #tpu.memory_space<vmem>>, vector<2x32xf32>,
    %34 = vector.extract_strided_slice %11 {offsets = [8, 0], sizes = [2, 32], strides = [1, 1]} : vector<16x32xf32> to vector<2x32xf32>
    %cst_21 = arith.constant dense<0.000000e+00> : vector<2x32xf32>
    %35 = tpu.matmul %32, %12, %cst_21 {dimension_numbers = #tpu.dot_dimension_numbers<[1], [0], [0], [1], [0, 0, 1, 1], [], []>} : vector<2x32xf32>, vector<32x32xf32>, vector<2x32xf32> -> vector<2x32xf32>
    %36 = arith.addf %34, %35 : vector<2x32xf32>
    %37 = math.tanh %36 : vector<2x32xf32>
    %c8 = arith.constant 8 : index
    %c0_22 = arith.constant 0 : index
    %38 = vector.load %arg10[%c8, %c0_22] : memref<16x32xf32, #tpu.memory_space<vmem>>, vector<2x32xf32>
    tpu.vector_store %arg10[%c8, %c0_22], %37 {strides = array<i32>} : memref<16x32xf32, #tpu.memory_space<vmem>>, vector<2x32xf32>,
    %39 = vector.extract_strided_slice %11 {offsets = [10, 0], sizes = [2, 32], strides = [1, 1]} : vector<16x32xf32> to vector<2x32xf32>
    %cst_23 = arith.constant dense<0.000000e+00> : vector<2x32xf32>
    %40 = tpu.matmul %37, %12, %cst_23 {dimension_numbers = #tpu.dot_dimension_numbers<[1], [0], [0], [1], [0, 0, 1, 1], [], []>} : vector<2x32xf32>, vector<32x32xf32>, vector<2x32xf32> -> vector<2x32xf32>
    %41 = arith.addf %39, %40 : vector<2x32xf32>
    %42 = math.tanh %41 : vector<2x32xf32>
    %c10 = arith.constant 10 : index
    %c0_24 = arith.constant 0 : index
    %43 = vector.load %arg10[%c10, %c0_24] : memref<16x32xf32, #tpu.memory_space<vmem>>, vector<2x32xf32>
    tpu.vector_store %arg10[%c10, %c0_24], %42 {strides = array<i32>} : memref<16x32xf32, #tpu.memory_space<vmem>>, vector<2x32xf32>,
    %44 = vector.extract_strided_slice %11 {offsets = [12, 0], sizes = [2, 32], strides = [1, 1]} : vector<16x32xf32> to vector<2x32xf32>
    %cst_25 = arith.constant dense<0.000000e+00> : vector<2x32xf32>
    %45 = tpu.matmul %42, %12, %cst_25 {dimension_numbers = #tpu.dot_dimension_numbers<[1], [0], [0], [1], [0, 0, 1, 1], [], []>} : vector<2x32xf32>, vector<32x32xf32>, vector<2x32xf32> -> vector<2x32xf32>
    %46 = arith.addf %44, %45 : vector<2x32xf32>
    %47 = math.tanh %46 : vector<2x32xf32>
    %c12 = arith.constant 12 : index
    %c0_26 = arith.constant 0 : index
    %48 = vector.load %arg10[%c12, %c0_26] : memref<16x32xf32, #tpu.memory_space<vmem>>, vector<2x32xf32>
    tpu.vector_store %arg10[%c12, %c0_26], %47 {strides = array<i32>} : memref<16x32xf32, #tpu.memory_space<vmem>>, vector<2x32xf32>,
    %49 = vector.extract_strided_slice %11 {offsets = [14, 0], sizes = [2, 32], strides = [1, 1]} : vector<16x32xf32> to vector<2x32xf32>
    %cst_27 = arith.constant dense<0.000000e+00> : vector<2x32xf32>
    %50 = tpu.matmul %47, %12, %cst_27 {dimension_numbers = #tpu.dot_dimension_numbers<[1], [0], [0], [1], [0, 0, 1, 1], [], []>} : vector<2x32xf32>, vector<32x32xf32>, vector<2x32xf32> -> vector<2x32xf32>
    %51 = arith.addf %49, %50 : vector<2x32xf32>
    %52 = math.tanh %51 : vector<2x32xf32>
    %c14 = arith.constant 14 : index
    %c0_28 = arith.constant 0 : index
    %53 = vector.load %arg10[%c14, %c0_28] : memref<16x32xf32, #tpu.memory_space<vmem>>, vector<2x32xf32>
    tpu.vector_store %arg10[%c14, %c0_28], %52 {strides = array<i32>} : memref<16x32xf32, #tpu.memory_space<vmem>>, vector<2x32xf32>,
    %c0_29 = arith.constant 0 : index
    %c0_30 = arith.constant 0 : index
    %54 = vector.load %arg10[%c0_29, %c0_30] : memref<16x32xf32, #tpu.memory_space<vmem>>, vector<16x32xf32>
    %c0_31 = arith.constant 0 : index
    %c0_32 = arith.constant 0 : index
    %55 = vector.load %arg7[%c0_31, %c0_32] : memref<32x128xf32, #tpu.memory_space<vmem>>, vector<32x128xf32>
    %cst_33 = arith.constant dense<0.000000e+00> : vector<16x128xf32>
    %56 = tpu.matmul %54, %55, %cst_33 {dimension_numbers = #tpu.dot_dimension_numbers<[1], [0], [0], [1], [0, 0, 1, 1], [], []>} : vector<16x32xf32>, vector<32x128xf32>, vector<16x128xf32> -> vector<16x128xf32>
    %c0_34 = arith.constant 0 : index
    %c0_35 = arith.constant 0 : index
    %57 = vector.load %arg8[%c0_34, %c0_35] : memref<1x128xf32, #tpu.memory_space<vmem>>, vector<1x128xf32>
    %58 = vector.broadcast %57 : vector<1x128xf32> to vector<16x128xf32>
    %59 = arith.addf %56, %58 : vector<16x128xf32>
    %c0_36 = arith.constant 0 : index
    %c0_37 = arith.constant 0 : index
    %60 = vector.load %arg9[%c0_36, %c0_37] : memref<16x128xf32, #tpu.memory_space<vmem>>, vector<16x128xf32>
    tpu.vector_store %arg9[%c0_36, %c0_37], %59 {strides = array<i32>} : memref<16x128xf32, #tpu.memory_space<vmem>>, vector<16x128xf32>,
    return
  }
  func.func @transform_0(%arg0: i32) -> (i32, i32) {
    %c0_i32 = arith.constant 0 : i32
    %c0_i32_0 = arith.constant 0 : i32
    %c0_i32_1 = arith.constant 0 : i32
    return %c0_i32, %c0_i32_0 : i32, i32
  }
  func.func @transform_1(%arg0: i32) -> (i32, i32) {
    %c0_i32 = arith.constant 0 : i32
    %c0_i32_0 = arith.constant 0 : i32
    %c0_i32_1 = arith.constant 0 : i32
    return %c0_i32, %c0_i32_0 : i32, i32
  }
  func.func @transform_2(%arg0: i32) -> (i32, i32) {
    %c0_i32 = arith.constant 0 : i32
    %c0_i32_0 = arith.constant 0 : i32
    %c0_i32_1 = arith.constant 0 : i32
    return %c0_i32, %c0_i32_0 : i32, i32
  }
  func.func @transform_3(%arg0: i32) -> (i32, i32) {
    %c0_i32 = arith.constant 0 : i32
    %c0_i32_0 = arith.constant 0 : i32
    %c0_i32_1 = arith.constant 0 : i32
    return %c0_i32, %c0_i32_0 : i32, i32
  }
  func.func @transform_4(%arg0: i32) -> (i32, i32) {
    %c0_i32 = arith.constant 0 : i32
    %c0_i32_0 = arith.constant 0 : i32
    %c0_i32_1 = arith.constant 0 : i32
    return %c0_i32, %c0_i32_0 : i32, i32
  }
  func.func @transform_5(%arg0: i32) -> (i32, i32) {
    %c0_i32 = arith.constant 0 : i32
    %c0_i32_0 = arith.constant 0 : i32
    %c0_i32_1 = arith.constant 0 : i32
    return %c0_i32, %c0_i32_0 : i32, i32
  }
  func.func @transform_6(%arg0: i32) -> (i32, i32) {
    %c0_i32 = arith.constant 0 : i32
    %c0_i32_0 = arith.constant 0 : i32
    %c0_i32_1 = arith.constant 0 : i32
    return %c0_i32, %c0_i32_0 : i32, i32
  }
  func.func @transform_7(%arg0: i32) -> (i32, i32) {
    %c0_i32 = arith.constant 0 : i32
    %c0_i32_0 = arith.constant 0 : i32
    %c0_i32_1 = arith.constant 0 : i32
    return %c0_i32, %c0_i32_0 : i32, i32
  }
  func.func @transform_8(%arg0: i32) -> (i32, i32) {
    %c0_i32 = arith.constant 0 : i32
    %c0_i32_0 = arith.constant 0 : i32
    %c0_i32_1 = arith.constant 0 : i32
    return %c0_i32, %c0_i32_0 : i32, i32
  }
}

</mosaic_0001>

<bundles_post_ra>
// kernel: tpu_custom_call.1
= control target key start
LH: loop header
LB: loop body
LE: loop exit
PB: predicated region body
PF: predicated region fallthrough
CT: control target
= control target key end

     0   :  { %v485_v2 = vmov 0   ;;  %s680_s0 = inlined_call_operand.vmem [shape: s32[16,1], index: 0, kind: input, shape index: {}]   ;;  %s681_s1 = inlined_call_operand.vmem [shape: f32[128,32], index: 1, kind: input, shape index: {}]   ;;  %s682_s2 = inlined_call_operand.vmem [shape: f32[32,32], index: 2, kind: input, shape index: {}]   ;;  %s683_s3 = inlined_call_operand.vmem [shape: f32[32,32], index: 3, kind: input, shape index: {}]   ;;  %s684_s4 = inlined_call_operand.vmem [shape: f32[16,32], index: 4, kind: input, shape index: {}]   ;;  %s685_s5 = inlined_call_operand.vmem [shape: f32[2,32], index: 5, kind: input, shape index: {}]   ;;  %s686_s6 = inlined_call_operand.vmem [shape: f32[32,128], index: 6, kind: input, shape index: {}]   ;;  %s687_s7 = inlined_call_operand.vmem [shape: f32[1,128], index: 7, kind: input, shape index: {}]   ;;  %s688_s8 = inlined_call_operand.hbm [shape: f32[16,128], index: 8, kind: output, shape index: {}]  }
   0x1   :  { %v30_v0 = vld [vmem:[%s680_s0] sm:$0xff]  ;;  %v61_v1 = vld [vmem:[%s681_s1 + $0x78] sm:$0xff]  ;;  %441 = vset.pattern.permute.xlu0 %v485_v2  ;;  %v60_v3 = vld [vmem:[%s681_s1 + $0x70] sm:$0xff] }
   0x2   :  { %62 = vmatpush.msra.mxu0 %v61_v1  ;;  %35 = vperm.xlu0 %441, %v30_v0   ;;  %v59_v4 = vld [vmem:[%s681_s1 + $0x68] sm:$0xff]  ;;  %v58_v5 = vld [vmem:[%s681_s1 + $0x60] sm:$0xff]  ;;  %v57_v6 = vld [vmem:[%s681_s1 + $0x58] sm:$0xff] }
   0x4   :  { %63 = vmatpush.msra.mxu0 %v60_v3 }
   0x6   :  { %64 = vmatpush.msra.mxu0 %v59_v4 }
   0x7   :  { %13 = vsyncpa [#allocation4], 0  ;;  %v31_v7 = vld [vmem:[%s680_s0 + $0x8] sm:$0xff]  ;;  %v56_v8 = vld [vmem:[%s681_s1 + $0x50] sm:$0xff]  ;;  %vm91_vm0 = vcmask 261120   ;;  %v32_v27 = vlaneseq  ;;  %v486_v30 = vmov 1.0  }
   0x8   :  { %65 = vmatpush.msra.mxu0 %v58_v5  ;;  %v55_v9 = vld [vmem:[%s681_s1 + $0x48] sm:$0xff]  ;;  %v54_v10 = vld [vmem:[%s681_s1 + $0x40] sm:$0xff]  ;;  %v53_v11 = vld [vmem:[%s681_s1 + $0x38] sm:$0xff]  ;;  %vm151_vm3 = vcmask 254976   ;;  %vm181_vm4 = vcmask 257026   ;;  %vm212_vm5 = vcmask 259076  }
   0x9   :  { %v52_v12 = vld [vmem:[%s681_s1 + $0x30] sm:$0xff]  ;;  %v51_v13 = vld [vmem:[%s681_s1 + $0x28] sm:$0xff]  ;;  %v50_v14 = vld [vmem:[%s681_s1 + $0x20] sm:$0xff]  ;;  %v33_v28 = vand.u32 127, %v32_v27  ;;  %vm243_vm6 = vcmask 261126   ;;  %s408_s24 = sshll.u32 %s688_s8, 4  ;;  %s409_s24 = int_to_ptr.hbm [resolvable:$true] %s408_s24 }
   0xa   :  { %66 = vmatpush.msra.mxu0 %v57_v6  ;;  %38 = vperm.xlu0 %441, %v31_v7   ;;  %v49_v15 = vld [vmem:[%s681_s1 + $0x18] sm:$0xff]  ;;  %v48_v16 = vld [vmem:[%s681_s1 + $0x10] sm:$0xff]  ;;  %v47_v17 = vld [vmem:[%s681_s1 + $0x8] sm:$0xff]  ;;  %s489_s25 = smov 8  }
   0xb   :  { %v46_v18 = vld [vmem:[%s681_s1] sm:$0xff]  ;;  %v592_v19 = vld [vmem:[%s683_s3 + $0x18] sm:$0xff]  ;;  %v597_v20 = vld [vmem:[%s683_s3 + $0x10] sm:$0xff]  ;;  %s488_s1 = smov 128  }
   0xc   :  { %67 = vmatpush.msra.mxu0 %v56_v8  ;;  %v88_v21 = vld [vmem:[%s682_s2 + $0x18] sm:$0xff]  ;;  %141 = vmatpush.msra.mxu2 %v592_v19  ;;  %v87_v22 = vld [vmem:[%s682_s2 + $0x10] sm:$0xff]  ;;  %v122_v23 = vld [vmem:[%s683_s3 + $0x8] sm:$0xff] }
   0xd   :  { %110 = vmatpush.msra.mxu1 %v88_v21  ;;  %v86_v24 = vld [vmem:[%s682_s2 + $0x8] sm:$0xff]  ;;  %168 = vmatpush.msra.mxu3 %v592_v19  ;;  %v121_v25 = vld [vmem:[%s683_s3] sm:$0xff]  ;;  %v366_v56 = vld [vmem:[%s686_s6 + $0x18] sm:$0xff] }
   0xe   :  { %68 = vmatpush.msra.mxu0 %v55_v9  ;;  %142 = vmatpush.msra.mxu2 %v597_v20  ;;  %v125_v26 = vld [vmem:[%s685_s5] sm:$0x3]  ;;  %v365_v57 = vld [vmem:[%s686_s6 + $0x10] sm:$0xff]  ;;  %v364_v58 = vld [vmem:[%s686_s6 + $0x8] sm:$0xff] }
   0xf   :  { %111 = vmatpush.msra.mxu1 %v87_v22  ;;  %169 = vmatpush.msra.mxu3 %v597_v20  ;;  %v85_v32 = vld [vmem:[%s682_s2] sm:$0xff]  ;;  %v90_v61 = vld [vmem:[%s684_s4 + $0x8] sm:$0xff] }
  0x10   :  { %69 = vmatpush.msra.mxu0 %v54_v10  ;;  %143 = vmatpush.msra.mxu2 %v122_v23  ;;  %v89_v35 = vld [vmem:[%s684_s4] sm:$0xff]  ;;  %s487_s4 = smov [#allocation3]  }
  0x11   :  { %112 = vmatpush.msra.mxu1 %v86_v24  ;;  %170 = vmatpush.msra.mxu3 %v122_v23  ;;  %v363_v59 = vld [vmem:[%s686_s6] sm:$0xff] }
  0x12   :  { %70 = vmatpush.msra.mxu0 %v53_v11  ;;  %144 = vmatpush.msra.mxu2 %v121_v25  ;;  %v442_v6 = vld [vmem:[%s687_s7] ss:$0 sm:$0xff]  ;;  %s406_s7 = sshll.u32 %s487_s4, 4  ;;  %s407_s7 = int_to_ptr.vmem [resolvable:$true] %s406_s7 }
  0x13   :  { %426 = vmatmul.msk.f32.vlgmr.msra.gmra.mxu2 %vm91_vm0, %v125_v26  ;;  %171 = vmatpush.msra.mxu3 %v121_v25 }
  0x14   :  { %71 = vmatpush.msra.mxu0 %v52_v12  ;;  %199 = vmatpush.msrb.mxu2 %v592_v19 }
  0x15   :  { %230 = vmatpush.msrb.mxu3 %v592_v19  ;;  %113 = vmatpush.msra.mxu1 %v85_v32 }
  0x16   :  { %72 = vmatpush.msra.mxu0 %v51_v13  ;;  %200 = vmatpush.msrb.mxu2 %v597_v20 }
  0x17   :  { %231 = vmatpush.msrb.mxu3 %v597_v20  ;;  %261 = vmatpush.msrb.mxu1 %v592_v19 }
  0x18   :  { %73 = vmatpush.msra.mxu0 %v50_v14  ;;  %201 = vmatpush.msrb.mxu2 %v122_v23 }
  0x19   :  { %232 = vmatpush.msrb.mxu3 %v122_v23  ;;  %262 = vmatpush.msrb.mxu1 %v597_v20 }
  0x1a   :  { %74 = vmatpush.msra.mxu0 %v49_v15  ;;  %202 = vmatpush.msrb.mxu2 %v121_v25 }
  0x1b   :  { %233 = vmatpush.msrb.mxu3 %v121_v25  ;;  %263 = vmatpush.msrb.mxu1 %v122_v23 }
  0x1c   :  { %75 = vmatpush.msra.mxu0 %v48_v16  ;;  %287 = vmatpush.msra.mxu2 %v592_v19 }
  0x1d   :  { %264 = vmatpush.msrb.mxu1 %v121_v25 }
  0x1e   :  { %76 = vmatpush.msra.mxu0 %v47_v17  ;;  %288 = vmatpush.msra.mxu2 %v597_v20 }
  0x20   :  { %77 = vmatpush.msra.mxu0 %v46_v18  ;;  %289 = vmatpush.msra.mxu2 %v122_v23 }
  0x22   :  { %290 = vmatpush.msra.mxu2 %v121_v25 }
  0x74   :  { %v36_v29 = vpop.permute.xlu0 %35 }
  0x75   :  { %vm40_vm1 = vcmp.eq.s32.totalorder %v36_v29, %v33_v28 }
  0x76   :  { %422 = vmatmul.msk.f32.vlgmr.msra.gmra.mxu0 %vm40_vm1, %v486_v30 }
  0x7c   :  { %v39_v31 = vpop.permute.xlu0 %38 }
  0x7d   :  { %vm41_vm2 = vcmp.eq.s32.totalorder %v39_v31, %v33_v28 }
  0x7e   :  { %423 = vmatmul.msk.f32.gmra.mxu0 %vm41_vm2, %v486_v30 }
  0x96   :  { %v146_v37 = vpop.f32.mrf.mxu2 }
  0xf3   :  { %v79_v33 = vpop.f32.mrf.mxu0 }
  0xf4   :  { %424 = vmatmul.msk.f32.vlgmr.msra.gmra.mxu1 %vm91_vm0, %v79_v33 }
  0xf5   :  { %347 = vmatpush.msra.mxu1 %v592_v19 }
  0xf7   :  { %348 = vmatpush.msra.mxu1 %v597_v20 }
  0xf9   :  { %349 = vmatpush.msra.mxu1 %v122_v23 }
  0xfb   :  { %v82_v34 = vpop.f32.mrf.mxu0  ;;  %350 = vmatpush.msra.mxu1 %v121_v25 }
  0xfc   :  { %425 = vmatmul.msk.f32.gmra.mxu1 %vm91_vm0, %v82_v34 }
 0x171   :  { %v115_v36 = vpop.f32.mrf.mxu1 }
 0x172   :  { %v116_v38 = vadd.f32 %v115_v36, %v89_v35 }
 0x174   :  { %v149_v39 = vadd.f32 %v146_v37, %v116_v38 }
 0x176   :  { %443 = vtanh.f32 %v149_v39 }
 0x179   :  { %v118_v60 = vpop.f32.mrf.mxu1 }
 0x17a   :  { %v119_v62 = vadd.f32 %v118_v60, %v90_v61 }
 0x17c   :  { %v444_v40 = vpop.eup %443 }
 0x17d   :  { %152 = vst.msk [vmem:[#allocation2] sm:$0x3] %vm151_vm3, %v444_v40  ;;  %427 = vmatmul.msk.f32.vlgmr.msra.gmra.mxu3 %vm91_vm0, %v444_v40 }
 0x17e   :  { %317 = vmatpush.msra.mxu3 %v592_v19 }
 0x180   :  { %318 = vmatpush.msra.mxu3 %v597_v20 }
 0x182   :  { %319 = vmatpush.msra.mxu3 %v122_v23 }
 0x184   :  { %320 = vmatpush.msra.mxu3 %v121_v25 }
 0x200   :  { %v173_v41 = vpop.f32.mrf.mxu3 }
 0x201   :  { %v177_v42 = vrot.slane %v173_v41, 6 }
 0x203   :  { %v179_v43 = vadd.f32 %v177_v42, %v116_v38 }
 0x205   :  { %445 = vtanh.f32 %v179_v43 }
 0x20b   :  { %v446_v44 = vpop.eup %445 }
 0x20c   :  { %182 = vst.msk [vmem:[#allocation2] sm:$0xc] %vm181_vm4, %v446_v44  ;;  %v184_v45 = vrot.slane %v446_v44, 2 }
 0x20e   :  { %428 = vmatmul.msk.f32.vlgmr.msrb.gmra.mxu2 %vm91_vm0, %v184_v45 }
 0x20f   :  { %389 = vmatpush.msrb.mxu2 %v366_v56 }
 0x211   :  { %390 = vmatpush.msrb.mxu2 %v365_v57 }
 0x213   :  { %391 = vmatpush.msrb.mxu2 %v364_v58 }
 0x215   :  { %392 = vmatpush.msrb.mxu2 %v363_v59 }
 0x291   :  { %v204_v46 = vpop.f32.mrf.mxu2 }
 0x292   :  { %v208_v47 = vrot.slane %v204_v46, 4 }
 0x294   :  { %v210_v48 = vadd.f32 %v208_v47, %v116_v38 }
 0x296   :  { %447 = vtanh.f32 %v210_v48 }
 0x29c   :  { %v448_v49 = vpop.eup %447 }
 0x29d   :  { %213 = vst.msk [vmem:[#allocation2] sm:$0x30] %vm212_vm5, %v448_v49  ;;  %v215_v50 = vrot.slane %v448_v49, 4 }
 0x29f   :  { %429 = vmatmul.msk.f32.vlgmr.msrb.gmra.mxu3 %vm91_vm0, %v215_v50 }
 0x322   :  { %v235_v51 = vpop.f32.mrf.mxu3 }
 0x323   :  { %v239_v52 = vrot.slane %v235_v51, 2 }
 0x325   :  { %v241_v53 = vadd.f32 %v239_v52, %v116_v38 }
 0x327   :  { %449 = vtanh.f32 %v241_v53 }
 0x32d   :  { %v450_v54 = vpop.eup %449 }
 0x32e   :  { %244 = vst.msk [vmem:[#allocation2] sm:$0xc0] %vm243_vm6, %v450_v54  ;;  %v246_v55 = vrot.slane %v450_v54, 6 }
 0x330   :  { %430 = vmatmul.msk.f32.vlgmr.msrb.gmra.mxu1 %vm91_vm0, %v246_v55 }
 0x335   :  { %v361_v2 = vld [vmem:[#allocation2] sm:$0xff] }
 0x3ad   :  { %v266_v63 = vpop.f32.mrf.mxu1 }
 0x3ae   :  { %v269_v0 = vadd.f32 %v266_v63, %v119_v62 }
 0x3b0   :  { %451 = vtanh.f32 %v269_v0 }
 0x3b6   :  { %v452_v1 = vpop.eup %451 }
 0x3b7   :  { %271 = vst.msk [vmem:[#allocation2 + $0x8] sm:$0x3] %vm151_vm3, %v452_v1  ;;  %431 = vmatmul.msk.f32.vlgmr.msra.gmra.mxu2 %vm91_vm0, %v452_v1 }
 0x3bf   :  { %434 = vmatmul.msk.f32.vlgmr.msrb.gmra.mxu2 %vm91_vm0, %v361_v2 }
 0x43a   :  { %v292_v3 = vpop.f32.mrf.mxu2 }
 0x43b   :  { %v296_v4 = vrot.slane %v292_v3, 6 }
 0x43d   :  { %v298_v5 = vadd.f32 %v296_v4, %v119_v62 }
 0x43f   :  { %453 = vtanh.f32 %v298_v5 }
 0x442   :  { %v394_v7 = vpop.f32.mrf.mxu2 }
 0x443   :  { %v395_v8 = vadd.f32 %v442_v6, %v394_v7 }
 0x445   :  { %v454_v9 = vpop.eup %453  ;;  %400 = vst [vmem:[#allocation3] sm:$0xff] %v395_v8 }
 0x446   :  { %300 = vst.msk [vmem:[#allocation2 + $0x8] sm:$0xc] %vm181_vm4, %v454_v9  ;;  %v302_v10 = vrot.slane %v454_v9, 2 }
 0x448   :  { %432 = vmatmul.msk.f32.vlgmr.msra.gmra.mxu3 %vm91_vm0, %v302_v10 }
 0x4cb   :  { %v322_v11 = vpop.f32.mrf.mxu3 }
 0x4cc   :  { %v326_v12 = vrot.slane %v322_v11, 4 }
 0x4ce   :  { %v328_v13 = vadd.f32 %v326_v12, %v119_v62 }
 0x4d0   :  { %455 = vtanh.f32 %v328_v13 }
 0x4d6   :  { %v456_v14 = vpop.eup %455 }
 0x4d7   :  { %330 = vst.msk [vmem:[#allocation2 + $0x8] sm:$0x30] %vm212_vm5, %v456_v14  ;;  %v332_v15 = vrot.slane %v456_v14, 4 }
 0x4d9   :  { %433 = vmatmul.msk.f32.vlgmr.msra.gmra.mxu1 %vm91_vm0, %v332_v15 }
 0x556   :  { %v352_v16 = vpop.f32.mrf.mxu1 }
 0x557   :  { %v356_v17 = vrot.slane %v352_v16, 2 }
 0x559   :  { %v358_v18 = vadd.f32 %v356_v17, %v119_v62 }
 0x55b   :  { %457 = vtanh.f32 %v358_v18 }
 0x561   :  { %v458_v19 = vpop.eup %457 }
 0x562   :  { %360 = vst.msk [vmem:[#allocation2 + $0x8] sm:$0xc0] %vm243_vm6, %v458_v19 }
 0x569   :  { %v362_v20 = vld [vmem:[#allocation2 + $0x8] sm:$0xff] }
 0x56a   :  { %435 = vmatmul.msk.f32.gmra.mxu2 %vm91_vm0, %v362_v20 }
 0x5ed   :  { %v397_v21 = vpop.f32.mrf.mxu2 }
 0x5ee   :  { %v398_v22 = vadd.f32 %v442_v6, %v397_v21 }
 0x5f0   :  { %401 = vst [vmem:[#allocation3 + $0x8] sm:$0xff] %v398_v22 }
 0x5f1   :  { %414 = dma.vmem_to_hbm [thread:$0]  %s407_s7, 256, %s409_s24, [#allocation4], %s488_s1, %s488_s1, %s489_s25  }
 0x5f2   :  { %483 = dma.done.wait [#allocation4], 256  }
 0x5f3   :  { %484 = vsyncadd [#allocation4], 4294967040 }
 0x5f4   :  { %419 = vsyncpa [#allocation4], 1 }

</bundles_post_ra>
